<compile_context>
chip_gen: v7x
topology: tpu7x:2x2x1
jax: 0.10.0
libtpu: 0.0.40
codegen_flags: <defaults>
</compile_context>

<pallas_src>
import math

import jax
import jax.numpy as jnp
from jax.experimental import pallas as pl
from jax.experimental.pallas import tpu as pltpu

_MiB = 1024 * 1024


def _add_kernel(x1_ref, x2_ref, o_ref):
    # Pure elementwise add in the promoted dtype (matches torch's `x1 + x2`).
    o_ref[...] = (x1_ref[...] + x2_ref[...]).astype(o_ref.dtype)


def _chip_budget():
    """Return (target tile bytes per input buffer, recommended vmem_limit_bytes)."""
    try:
        kind = jax.devices()[0].device_kind.lower()
    except Exception:  # pragma: no cover - defensive; fall through to default
        kind = ""
    if "v7" in kind:
        # 64 MiB physical VMEM, 3.2 TB/s HBM: big tiles, but leave headroom.
        return 6 * _MiB, 52 * _MiB
    if "v6" in kind:
        return 4 * _MiB, 48 * _MiB
    if "v5" in kind:
        # 16 MiB scoped default is tight; keep 2 MiB tiles but raise the limit.
        return 2 * _MiB, 24 * _MiB
    return 4 * _MiB, 40 * _MiB


def _round_up(x, m):
    return ((x + m - 1) // m) * m


def _pick_lane_width(total):
    """Largest multiple of 128 (<= 4096) that divides `total`, else None."""
    for w in range(4096, 127, -128):
        if total % w == 0:
            return w
    return None


def quant_add(x1, x2, *, row_tile=None, hidden_tile=None, donate_x1=False):
    """QuantAdd.forward with use_act_quant=False: out = x1 + x2."""
    assert x1.shape == x2.shape, "x1 and x2 must have identical shapes"
    out_dtype = jnp.promote_types(x1.dtype, x2.dtype)
    orig_shape = x1.shape

    if len(orig_shape) == 0:
        return (x1 + x2).astype(out_dtype)
    total = math.prod(orig_shape)
    if total == 0:
        return jnp.zeros(orig_shape, out_dtype)

    x1 = x1.astype(out_dtype)
    x2 = x2.astype(out_dtype)
    itemsize = jnp.dtype(out_dtype).itemsize
    # Dtype-native sublane granularity: 8 (f32), 16 (bf16), 32 (int8/fp8).
    min_sub = max(8, 32 // itemsize)
    target_bytes, vmem_reco = _chip_budget()

    # ---- choose the 2-D layout ---------------------------------------------
    # Prefer a lane-dense view: sub-128 / ragged lane widths force masked
    # partial stores and narrow DMAs.  Only skipped if the user pinned a
    # hidden_tile or no multiple of 128 divides the element count.
    lane_dense_w = None if hidden_tile is not None else _pick_lane_width(total)
    if lane_dense_w is not None:
        hidden = lane_dense_w
        rows = total // hidden
        h_tile = hidden  # single dense lane block
    else:
        # Fallback: keep the original trailing axis as lanes (Pallas masks the
        # ragged last lane block — correct, just slower stores).
        hidden = orig_shape[-1]
        rows = total // hidden
        if hidden_tile is not None:
            h_tile = min(hidden, max(128, _round_up(int(hidden_tile), 128)))
        else:
            # Keep the full hidden dim as one lane block up to 8192; shrink the
            # row tile instead of splitting lanes (better DMA efficiency).
            h_tile = hidden if hidden <= 8192 else 4096

    x1_2d = x1.reshape(rows, hidden)
    x2_2d = x2.reshape(rows, hidden)

    # ---- row (sublane) tile --------------------------------------------------
    if row_tile is None:
        r_tile = max(min_sub, target_bytes // max(1, h_tile * itemsize))
        r_tile = (r_tile // min_sub) * min_sub
    else:
        r_tile = max(min_sub, _round_up(int(row_tile), min_sub))

    lane_blocks = pl.cdiv(hidden, h_tile)
    if r_tile >= rows:
        if rows >= 64 and lane_blocks == 1:
            # Guarantee >= 2 grid blocks so "parallel" semantics can shard work
            # across both TensorCores on v7x (harmless on 1-TC chips).
            r_tile = _round_up(pl.cdiv(rows, 2), min_sub)
        else:
            r_tile = rows  # single full-dim block (exempt from (8,128) rule)

    grid = (pl.cdiv(rows, r_tile), pl.cdiv(hidden, h_tile))
    spec = pl.BlockSpec((r_tile, h_tile), lambda i, j: (i, j))

    # 3 arrays x 2 double-buffers x tile, plus headroom for compiler scratch.
    tile_bytes = r_tile * h_tile * itemsize
    vmem_limit = int(max(vmem_reco, 6 * tile_bytes + 8 * _MiB))

    io_aliases = {0: 0} if (donate_x1 and x1_2d.dtype == out_dtype) else {}

    out_2d = pl.pallas_call(
        _add_kernel,
        out_shape=jax.ShapeDtypeStruct((rows, hidden), out_dtype),
        grid=grid,
        in_specs=[spec, spec],
        out_specs=spec,
        input_output_aliases=io_aliases,
        compiler_params=pltpu.CompilerParams(
            # Both grid axes are independent -> shard across TensorCores.
            dimension_semantics=("parallel", "parallel"),
            vmem_limit_bytes=vmem_limit,
        ),
    )(x1_2d, x2_2d)

    return out_2d.reshape(orig_shape)


if __name__ == "__main__":
    key = jax.random.PRNGKey(0)
    k1, k2, k3, k4, k5, k6, k7, k8 = jax.random.split(key, 8)

    # 1) Small residual-add shape (batch, seq, hidden): total = 512, so the
    #    wrapper takes the lane-dense path (1, 512) despite hidden=32.
    B, S, H = 2, 8, 32
    x1 = jax.random.normal(k1, (B, S, H), dtype=jnp.float32)
    x2 = jax.random.normal(k2, (B, S, H), dtype=jnp.float32)
    out = quant_add(x1, x2)
    jax.block_until_ready(out)
    ref = x1 + x2
    assert out.shape == x1.shape and out.dtype == ref.dtype
    assert jnp.allclose(out, ref, atol=1e-6, rtol=1e-6)

    # 2) Fallback path: total not divisible by 128, bf16 -> (rows, hidden)
    #    layout with full-array block and masked ragged lanes.
    y1 = jax.random.normal(k3, (3, 5, 96), dtype=jnp.bfloat16)
    y2 = jax.random.normal(k4, (3, 5, 96), dtype=jnp.bfloat16)
    out2 = quant_add(y1, y2)
    jax.block_until_ready(out2)
    ref2 = y1 + y2
    assert out2.shape == y1.shape and out2.dtype == ref2.dtype
    assert jnp.allclose(out2.astype(jnp.float32), ref2.astype(jnp.float32),
                        atol=1e-2, rtol=1e-2)

    # 3) Lane-dense path with >= 2 row blocks (exercises the megacore split).
    z1 = jax.random.normal(k5, (8, 128, 256), dtype=jnp.float32)
    z2 = jax.random.normal(k6, (8, 128, 256), dtype=jnp.float32)
    out3 = quant_add(z1, z2)
    jax.block_until_ready(out3)
    ref3 = z1 + z2
    assert out3.shape == z1.shape and out3.dtype == ref3.dtype
    assert jnp.allclose(out3, ref3, atol=1e-6, rtol=1e-6)

    # 4) User-supplied tiles (clamped to dtype-safe multiples), ragged grid in
    #    both dimensions.
    w1 = jax.random.normal(k7, (5, 8, 384), dtype=jnp.bfloat16)
    w2 = jax.random.normal(k8, (5, 8, 384), dtype=jnp.bfloat16)
    out4 = quant_add(w1, w2, row_tile=16, hidden_tile=256)
    jax.block_until_ready(out4)
    ref4 = w1 + w2
    assert out4.shape == w1.shape and out4.dtype == ref4.dtype
    assert jnp.allclose(out4.astype(jnp.float32), ref4.astype(jnp.float32),
                        atol=1e-2, rtol=1e-2)

    print("KERNEL_OK")
</pallas_src>

<mosaic_0001>
module attributes {stable_mosaic.version = 11 : i64} {
  func.func @_add_kernel(%arg0: i32, %arg1: i32, %arg2: memref<1x512xf32, #tpu.memory_space<vmem>>, %arg3: memref<1x512xf32, #tpu.memory_space<vmem>>, %arg4: memref<1x512xf32, #tpu.memory_space<vmem>>) attributes {dimension_semantics = [#tpu.dimension_semantics<parallel>, #tpu.dimension_semantics<parallel>], iteration_bounds = array<i64: 1, 1>, scalar_prefetch = 0 : i64, scratch_operands = 0 : i64, tpu.core_type = #tpu.core_type<tc>, window_params = [{transform_indices = @transform_0, window_bounds = array<i64: 1, 512>}, {transform_indices = @transform_1, window_bounds = array<i64: 1, 512>}, {transform_indices = @transform_2, window_bounds = array<i64: 1, 512>}]} {
    %c0 = arith.constant 0 : index
    %c0_0 = arith.constant 0 : index
    %0 = vector.load %arg2[%c0, %c0_0] : memref<1x512xf32, #tpu.memory_space<vmem>>, vector<1x512xf32>
    %c0_1 = arith.constant 0 : index
    %c0_2 = arith.constant 0 : index
    %1 = vector.load %arg3[%c0_1, %c0_2] : memref<1x512xf32, #tpu.memory_space<vmem>>, vector<1x512xf32>
    %2 = arith.addf %0, %1 : vector<1x512xf32>
    %c0_3 = arith.constant 0 : index
    %c0_4 = arith.constant 0 : index
    %3 = vector.load %arg4[%c0_3, %c0_4] : memref<1x512xf32, #tpu.memory_space<vmem>>, vector<1x512xf32>
    tpu.vector_store %arg4[%c0_3, %c0_4], %2 {strides = array<i32>} : memref<1x512xf32, #tpu.memory_space<vmem>>, vector<1x512xf32>,
    return
  }
  func.func @transform_0(%arg0: i32, %arg1: i32) -> (i32, i32) {
    %c0_i32 = arith.constant 0 : i32
    return %arg0, %arg1 : i32, i32
  }
  func.func @transform_1(%arg0: i32, %arg1: i32) -> (i32, i32) {
    %c0_i32 = arith.constant 0 : i32
    return %arg0, %arg1 : i32, i32
  }
  func.func @transform_2(%arg0: i32, %arg1: i32) -> (i32, i32) {
    %c0_i32 = arith.constant 0 : i32
    return %arg0, %arg1 : i32, i32
  }
}

</mosaic_0001>

<bundles_post_ra>
// kernel: tpu_custom_call.1
= control target key start
LH: loop header
LB: loop body
LE: loop exit
PB: predicated region body
PF: predicated region fallthrough
CT: control target
= control target key end

     0   :  { %7 = vsyncpa [#allocation3], 0  ;;  %s189_s0 = inlined_call_operand.hbm [shape: f32[1,512], index: 0, kind: input, shape index: {}]   ;;  %s190_s1 = inlined_call_operand.hbm [shape: f32[1,512], index: 1, kind: input, shape index: {}]   ;;  %s191_s2 = inlined_call_operand.hbm [shape: f32[1,512], index: 2, kind: output, shape index: {}]  }
   0x1   :  { %8 = vsyncpa [#allocation6], 0 }
   0x2   :  { %9 = vsyncpa [#allocation4], 0  ;;  %s135_s9 = smov [#allocation2]   ;;  %s136_s11 = smov [#allocation5]  }
   0x3   :  { %s16_s10 = sshll.u32 %s135_s9, 4  ;;  %s26_s12 = sshll.u32 %s136_s11, 4  ;;  %s17_s10 = int_to_ptr.vmem [resolvable:$true] %s16_s10  ;;  %s27_s12 = int_to_ptr.vmem [resolvable:$true] %s26_s12 }
   0x4   :  { %s63_s15 = scalar_lea.hbm %s189_s0, 64 }
   0x5   :  { %p64_p0 = scmp.ne.s32.totalorder %s189_s0, %s63_s15  ;;  %p67_p1 = scmp.lt.u32.totalorder %s63_s15, %s189_s0 }
   0x7   :  { %p69_p2 = pnand %p67_p1, %p64_p0 }
   0x9   :  { %72 = shalt.err (!%p69_p2)
}
   0xa   :  { %s73_s20 = scalar_lea.vmem %s17_s10, 64  ;;  %p78_p4 = scmp.lt.s32.totalorder %s17_s10, %s17_s10 }
   0xb   :  { %p74_p3 = scmp.ne.s32.totalorder %s17_s10, %s73_s20  ;;  %p79_p5 = scmp.lt.s32.totalorder %s73_s20, %s73_s20 }
   0xd   :  { %p80_p6 = por %p79_p5, %p78_p4 }
   0xf   :  { %p81_p7 = pnand %p80_p6, %p74_p3 }
  0x11   :  { %84 = shalt.err (!%p81_p7)
}
  0x12   :  { %19 = dma.hbm_to_vmem [thread:$0]  %s189_s0, 64, %s17_s10, [#allocation3]  }
  0x13   :  { %s85_s25 = scalar_lea.hbm %s190_s1, 64 }
  0x14   :  { %p86_p8 = scmp.ne.s32.totalorder %s190_s1, %s85_s25  ;;  %p89_p9 = scmp.lt.u32.totalorder %s85_s25, %s190_s1 }
  0x16   :  { %p91_p10 = pnand %p89_p9, %p86_p8 }
  0x18   :  { %94 = shalt.err (!%p91_p10)
}
  0x19   :  { %s95_s30 = scalar_lea.vmem %s27_s12, 64  ;;  %p100_p12 = scmp.lt.s32.totalorder %s27_s12, %s27_s12 }
  0x1a   :  { %p96_p11 = scmp.ne.s32.totalorder %s27_s12, %s95_s30  ;;  %p101_p13 = scmp.lt.s32.totalorder %s95_s30, %s95_s30 }
  0x1c   :  { %p102_p0 = por %p101_p13, %p100_p12 }
  0x1e   :  { %p103_p1 = pnand %p102_p0, %p96_p11 }
  0x20   :  { %106 = shalt.err (!%p103_p1)
}
  0x21   :  { %29 = dma.hbm_to_vmem [thread:$0]  %s190_s1, 64, %s27_s12, [#allocation6]  }
  0x22   :  { %129 = dma.done.wait [#allocation3], 64  }
  0x23   :  { %130 = vsyncadd [#allocation3], 4294967232 }
  0x24   :  { %131 = dma.done.wait [#allocation6], 64  }
  0x25   :  { %132 = vsyncadd [#allocation6], 4294967232  ;;  %v39_v0 = vlaneseq  ;;  %s137_s4 = smov [#allocation7]   ;;  %v36_v1 = vld [vmem:[#allocation2] sm:$0xf] }
  0x26   :  { %s50_s5 = sshll.u32 %s137_s4, 4  ;;  %v37_v2 = vld [vmem:[#allocation5] sm:$0xf]  ;;  %s51_s5 = int_to_ptr.vmem [resolvable:$true] %s50_s5 }
  0x27   :  { %vm41_vm0 = vcmp.lt.s32.totalorder %v39_v0, 512  ;;  %v38_v3 = vadd.f32 %v37_v2, %v36_v1  ;;  %s107_s6 = scalar_lea.vmem %s51_s5, 64  ;;  %p112_p3 = scmp.lt.s32.totalorder %s51_s5, %s51_s5 }
  0x28   :  { %p108_p2 = scmp.ne.s32.totalorder %s51_s5, %s107_s6  ;;  %p113_p4 = scmp.lt.s32.totalorder %s107_s6, %s107_s6 }
  0x29   :  { %43 = vst.msk [vmem:[#allocation7] sm:$0xf] %vm41_vm0, %v38_v3 }
  0x2a   :  { %p114_p5 = por %p113_p4, %p112_p3 }
  0x2c   :  { %p115_p6 = pnand %p114_p5, %p108_p2 }
  0x2e   :  { %118 = shalt.err (!%p115_p6)
}
  0x2f   :  { %s119_s8 = scalar_lea.hbm %s191_s2, 64 }
  0x30   :  { %p120_p7 = scmp.ne.s32.totalorder %s191_s2, %s119_s8  ;;  %p123_p8 = scmp.lt.u32.totalorder %s119_s8, %s191_s2 }
  0x32   :  { %p125_p9 = pnand %p123_p8, %p120_p7 }
  0x34   :  { %128 = shalt.err (!%p125_p9)
}
  0x35   :  { %53 = dma.vmem_to_hbm [thread:$0]  %s51_s5, 64, %s191_s2, [#allocation4]  }
  0x36   :  { %133 = dma.done.wait [#allocation4], 64  }
  0x37   :  { %134 = vsyncadd [#allocation4], 4294967232 }
  0x38   :  { %57 = vsyncpa [#allocation3], 1 }
  0x39   :  { %58 = vsyncpa [#allocation6], 1 }
  0x3a   :  { %59 = vsyncpa [#allocation4], 1 }

</bundles_post_ra>
